<compile_context>
chip_gen: v6e
topology: v6e:2x2x1
jax: 0.10.0
libtpu: 0.0.40
codegen_flags: <defaults>
</compile_context>

<pallas_src>
import functools

import jax
import jax.numpy as jnp
from jax.experimental import pallas as pl
from jax.experimental.pallas import tpu as pltpu


def _self_attention_flash_kernel(
    xq_ref, xkv_ref, wq_ref, bq_ref, wk_ref, bk_ref, wv_ref, bv_ref,
    gamma_ref, lnw_ref, lnb_ref,
    o_ref,
    q_scratch, m_scratch, l_scratch, acc_scratch,
    *, scale, eps, n_valid, kv_tile, needs_mask):
    """Grid = (B, q_tiles, kv_tiles); kv is the innermost (reduction) axis."""
    ki = pl.program_id(2)
    n_kv = pl.num_programs(2)

    # --- init per (b, q-tile): project q once, reset online-softmax state -----
    @pl.when(ki == 0)
    def _init():
        xq = xq_ref[0]                                                  # (tq, C) f32
        q = jnp.dot(xq.astype(jnp.bfloat16), wq_ref[...],
                    preferred_element_type=jnp.float32) + bq_ref[...]    # (tq, D) f32
        q_scratch[...] = q.astype(jnp.bfloat16)
        m_scratch[...] = jnp.full_like(m_scratch, -jnp.inf)
        l_scratch[...] = jnp.zeros_like(l_scratch)
        acc_scratch[...] = jnp.zeros_like(acc_scratch)

    # --- per kv tile: project k/v, online softmax update ----------------------
    xkv = xkv_ref[0].astype(jnp.bfloat16)                               # (tk, C)
    k = jnp.dot(xkv, wk_ref[...], preferred_element_type=jnp.float32) + bk_ref[...]  # (tk, D)
    v = jnp.dot(xkv, wv_ref[...], preferred_element_type=jnp.float32) + bv_ref[...]  # (tk, C)

    # s[i, j] = <q_i, k_j> * scale  — contract last dims directly (no transpose).
    s = jax.lax.dot_general(
        q_scratch[...], k.astype(jnp.bfloat16),
        dimension_numbers=(((1,), (1,)), ((), ())),
        preferred_element_type=jnp.float32) * scale                     # (tq, tk)

    if needs_mask:
        kv_pos = ki * kv_tile + jax.lax.broadcasted_iota(jnp.int32, s.shape, 1)
        s = jnp.where(kv_pos < n_valid, s, -1e30)

    m_prev = m_scratch[...]
    m_new = jnp.maximum(m_prev, jnp.max(s, axis=-1, keepdims=True))
    alpha = jnp.exp(m_prev - m_new)
    p = jnp.exp(s - m_new)                                              # (tq, tk) f32
    l_scratch[...] = alpha * l_scratch[...] + jnp.sum(p, axis=-1, keepdims=True)
    acc_scratch[...] = alpha * acc_scratch[...] + jnp.dot(
        p.astype(jnp.bfloat16), v.astype(jnp.bfloat16),
        preferred_element_type=jnp.float32)
    m_scratch[...] = m_new

    # --- finalize: normalize, residual (gamma scalar from SMEM), LayerNorm ----
    @pl.when(ki == n_kv - 1)
    def _finalize():
        attn_out = acc_scratch[...] * pl.reciprocal(l_scratch[...], approx=True)
        xq = xq_ref[0].astype(jnp.float32)
        y = gamma_ref[0] * attn_out + xq                                 # (tq, C)
        mean = jnp.mean(y, axis=-1, keepdims=True)
        yc = y - mean
        var = jnp.mean(yc * yc, axis=-1, keepdims=True)
        y = yc * jax.lax.rsqrt(var + eps)
        y = y * lnw_ref[...] + lnb_ref[...]
        o_ref[0] = y.astype(o_ref.dtype)


def self_attention_pallas(x_nchw, params, *, token_tile=256):
    """x_nchw: (B, C, W, H) float32. Returns (B, C, W, H) float32."""
    B, C, W, H = x_nchw.shape
    N = W * H
    C8 = C // 8
    D = ((max(C8, 1) + 127) // 128) * 128      # lane-dense padded head dim (>=128)

    f32 = jnp.float32
    bf16 = jnp.bfloat16

    # NCHW -> (B, N, C): tokens on sublanes, channels on lanes.
    x_bnc = jnp.transpose(x_nchw.reshape(B, C, N), (0, 2, 1)).astype(f32)

    # Token tile (used for both q and kv tiles); multiple of 8 for sublane alignment.
    T = min(token_tile, N)
    T = ((T + 7) // 8) * 8
    n_tiles = -(-N // T)
    N_pad = n_tiles * T
    needs_mask = N_pad != N
    if needs_mask:
        x_bnc = jnp.pad(x_bnc, ((0, 0), (0, N_pad - N), (0, 0)))

    # Weights: bf16 for MXU operands; q/k projections zero-padded to D lanes so the
    # padded lanes contribute exactly 0 to the energy.
    wq_t = jnp.zeros((C, D), f32).at[:, :C8].set(params["wq"].T).astype(bf16)
    wk_t = jnp.zeros((C, D), f32).at[:, :C8].set(params["wk"].T).astype(bf16)
    wv_t = params["wv"].T.astype(bf16)                      # (C, C)
    bq = jnp.zeros((1, D), f32).at[0, :C8].set(params["bq"])
    bk = jnp.zeros((1, D), f32).at[0, :C8].set(params["bk"])
    bv = params["bv"].reshape(1, C).astype(f32)
    gamma = params["gamma"].reshape(1).astype(f32)          # SMEM scalar
    lnw = params["ln_w"].reshape(1, C).astype(f32)
    lnb = params["ln_b"].reshape(1, C).astype(f32)

    kernel = functools.partial(
        _self_attention_flash_kernel,
        scale=1.0 / (C ** 0.5), eps=1e-5,
        n_valid=N, kv_tile=T, needs_mask=needs_mask)

    const2 = lambda b, qi, ki: (0, 0)

    out_bnc = pl.pallas_call(
        kernel,
        out_shape=jax.ShapeDtypeStruct((B, N_pad, C), f32),
        grid_spec=pltpu.PrefetchScalarGridSpec(
            num_scalar_prefetch=0,
            grid=(B, n_tiles, n_tiles),
            in_specs=[
                pl.BlockSpec((1, T, C), lambda b, qi, ki: (b, qi, 0)),   # x (query rows)
                pl.BlockSpec((1, T, C), lambda b, qi, ki: (b, ki, 0)),   # x (kv rows)
                pl.BlockSpec((C, D), const2),                            # Wq^T (padded, bf16)
                pl.BlockSpec((1, D), const2),                            # bq   (padded)
                pl.BlockSpec((C, D), const2),                            # Wk^T (padded, bf16)
                pl.BlockSpec((1, D), const2),                            # bk   (padded)
                pl.BlockSpec((C, C), const2),                            # Wv^T (bf16)
                pl.BlockSpec((1, C), const2),                            # bv
                pl.BlockSpec(memory_space=pltpu.MemorySpace.SMEM),       # gamma (scalar)
                pl.BlockSpec((1, C), const2),                            # LN weight
                pl.BlockSpec((1, C), const2),                            # LN bias
            ],
            out_specs=pl.BlockSpec((1, T, C), lambda b, qi, ki: (b, qi, 0)),
            scratch_shapes=[
                pltpu.VMEM((T, D), bf16),    # q tile (lane-dense)
                pltpu.VMEM((T, 1), f32),     # running max
                pltpu.VMEM((T, 1), f32),     # running softmax denominator
                pltpu.VMEM((T, C), f32),     # output accumulator
            ]),
        compiler_params=pltpu.CompilerParams(
            dimension_semantics=("parallel", "parallel", "arbitrary"),
            vmem_limit_bytes=48 * 1024 * 1024),
    )(x_bnc, x_bnc, wq_t, bq, wk_t, bk, wv_t, bv, gamma, lnw, lnb)

    if needs_mask:
        out_bnc = out_bnc[:, :N, :]
    # (B, N, C) -> NCHW
    return jnp.transpose(out_bnc, (0, 2, 1)).reshape(B, C, W, H)


def self_attention_reference(x_nchw, params):
    """Pure-JAX f32 reference mirroring the PyTorch forward (dropout = identity)."""
    B, C, W, H = x_nchw.shape
    N = W * H
    x_flat = x_nchw.reshape(B, C, N)                                    # (B, C, N)
    q = jnp.einsum("oc,bcn->bon", params["wq"], x_flat) + params["bq"][None, :, None]
    k = jnp.einsum("oc,bcn->bon", params["wk"], x_flat) + params["bk"][None, :, None]
    v = jnp.einsum("oc,bcn->bon", params["wv"], x_flat) + params["bv"][None, :, None]
    proj_query = jnp.transpose(q, (0, 2, 1))                            # (B, N, C8)
    energy = jnp.einsum("bic,bcj->bij", proj_query, k)                  # (B, N, N)
    attn = jax.nn.softmax(energy / (C ** 0.5), axis=-1)
    out = jnp.einsum("bcj,bij->bci", v, attn)                           # (B, C, N)
    out = params["gamma"][0] * out + x_flat
    out = jnp.transpose(out, (0, 2, 1))                                 # (B, N, C)
    mean = jnp.mean(out, axis=-1, keepdims=True)
    var = jnp.mean((out - mean) ** 2, axis=-1, keepdims=True)
    out = (out - mean) / jnp.sqrt(var + 1e-5)
    out = out * params["ln_w"] + params["ln_b"]
    return jnp.transpose(out, (0, 2, 1)).reshape(B, C, W, H)


def init_params(key, in_dim):
    C = in_dim
    C8 = C // 8
    ks = jax.random.split(key, 6)
    s = 1.0 / (C ** 0.5)
    return {
        "wq": jax.random.uniform(ks[0], (C8, C), jnp.float32, -s, s),
        "bq": jax.random.uniform(ks[1], (C8,), jnp.float32, -s, s),
        "wk": jax.random.uniform(ks[2], (C8, C), jnp.float32, -s, s),
        "bk": jax.random.uniform(ks[3], (C8,), jnp.float32, -s, s),
        "wv": jax.random.uniform(ks[4], (C, C), jnp.float32, -s, s),
        "bv": jax.random.uniform(ks[5], (C,), jnp.float32, -s, s),
        "gamma": jnp.zeros((1,), jnp.float32),   # matches nn.Parameter(torch.zeros(1))
        "ln_w": jnp.ones((C,), jnp.float32),
        "ln_b": jnp.zeros((C,), jnp.float32),
    }


if __name__ == "__main__":
    key = jax.random.PRNGKey(0)
    k_x, k_p = jax.random.split(key)

    B, C, W, H = 2, 32, 8, 8        # in_dim=32 so C//8 = 4; N = 64 tokens
    x = jax.random.normal(k_x, (B, C, W, H), jnp.float32)
    params = init_params(k_p, C)
    # gamma initializes to 0 in the PyTorch module (output == LayerNorm(x)); use a
    # nonzero value here so the test actually exercises the attention path.
    params["gamma"] = jnp.array([0.5], jnp.float32)

    ref = jax.block_until_ready(self_attention_reference(x, params))

    # Single-tile path (T == N).
    out = jax.block_until_ready(self_attention_pallas(x, params))
    assert out.shape == (B, C, W, H)
    err = float(jnp.max(jnp.abs(out - ref)))
    # bf16 MXU operands + approx reciprocal -> looser tolerance vs the pure-f32 reference.
    assert err < 3e-2, f"max abs err {err}"

    # Multi-tile path: T=24 -> 3 kv tiles with online softmax + padded-token masking.
    out_tiled = jax.block_until_ready(self_attention_pallas(x, params, token_tile=24))
    err_tiled = float(jnp.max(jnp.abs(out_tiled - ref)))
    assert err_tiled < 3e-2, f"max abs err (tiled) {err_tiled}"

    print("KERNEL_OK")
</pallas_src>

<mosaic_0001>
module attributes {stable_mosaic.version = 11 : i64} {
  func.func @_self_attention_flash_kernel(%arg0: i32, %arg1: i32, %arg2: i32, %arg3: memref<1x64x32xf32, #tpu.memory_space<vmem>>, %arg4: memref<1x64x32xf32, #tpu.memory_space<vmem>>, %arg5: memref<32x128xbf16, #tpu.memory_space<vmem>>, %arg6: memref<1x128xf32, #tpu.memory_space<vmem>>, %arg7: memref<32x128xbf16, #tpu.memory_space<vmem>>, %arg8: memref<1x128xf32, #tpu.memory_space<vmem>>, %arg9: memref<32x32xbf16, #tpu.memory_space<vmem>>, %arg10: memref<1x32xf32, #tpu.memory_space<vmem>>, %arg11: memref<1xf32, #tpu.memory_space<smem>>, %arg12: memref<1x32xf32, #tpu.memory_space<vmem>>, %arg13: memref<1x32xf32, #tpu.memory_space<vmem>>, %arg14: memref<1x64x32xf32, #tpu.memory_space<vmem>>, %arg15: memref<64x128xbf16, #tpu.memory_space<vmem>>, %arg16: memref<64x1xf32, #tpu.memory_space<vmem>>, %arg17: memref<64x1xf32, #tpu.memory_space<vmem>>, %arg18: memref<64x32xf32, #tpu.memory_space<vmem>>) attributes {dimension_semantics = [#tpu.dimension_semantics<parallel>, #tpu.dimension_semantics<parallel>, #tpu.dimension_semantics<arbitrary>], iteration_bounds = array<i64: 2, 1, 1>, scalar_prefetch = 0 : i64, scratch_operands = 4 : i64, tpu.core_type = #tpu.core_type<tc>, window_params = [{transform_indices = @transform_0, window_bounds = array<i64: 1, 64, 32>}, {transform_indices = @transform_1, window_bounds = array<i64: 1, 64, 32>}, {pipeline_mode = #tpu.pipeline_mode<synchronous>, transform_indices = @transform_2, window_bounds = array<i64: 32, 128>}, {pipeline_mode = #tpu.pipeline_mode<synchronous>, transform_indices = @transform_3, window_bounds = array<i64: 1, 128>}, {pipeline_mode = #tpu.pipeline_mode<synchronous>, transform_indices = @transform_4, window_bounds = array<i64: 32, 128>}, {pipeline_mode = #tpu.pipeline_mode<synchronous>, transform_indices = @transform_5, window_bounds = array<i64: 1, 128>}, {pipeline_mode = #tpu.pipeline_mode<synchronous>, transform_indices = @transform_6, window_bounds = array<i64: 32, 32>}, {pipeline_mode = #tpu.pipeline_mode<synchronous>, transform_indices = @transform_7, window_bounds = array<i64: 1, 32>}, {transform_indices = @transform_8, window_bounds = array<i64: 1>}, {pipeline_mode = #tpu.pipeline_mode<synchronous>, transform_indices = @transform_9, window_bounds = array<i64: 1, 32>}, {pipeline_mode = #tpu.pipeline_mode<synchronous>, transform_indices = @transform_10, window_bounds = array<i64: 1, 32>}, {transform_indices = @transform_11, window_bounds = array<i64: 1, 64, 32>}]} {
    %c0_i32 = arith.constant 0 : i32
    %0 = arith.cmpi eq, %arg2, %c0_i32 : i32
    %1 = arith.extui %0 : i1 to i32
    %c0_i32_0 = arith.constant 0 : i32
    %2 = arith.cmpi ne, %1, %c0_i32_0 : i32
    scf.if %2 {
      %c0_33 = arith.constant 0 : index
      %c0_34 = arith.constant 0 : index
      %c0_35 = arith.constant 0 : index
      %48 = vector.load %arg3[%c0_33, %c0_34, %c0_35] : memref<1x64x32xf32, #tpu.memory_space<vmem>>, vector<1x64x32xf32>
      %49 = vector.shape_cast %48 : vector<1x64x32xf32> to vector<64x32xf32>
      %50 = arith.truncf %49 : vector<64x32xf32> to vector<64x32xbf16>
      %c0_36 = arith.constant 0 : index
      %c0_37 = arith.constant 0 : index
      %51 = vector.load %arg5[%c0_36, %c0_37] : memref<32x128xbf16, #tpu.memory_space<vmem>>, vector<32x128xbf16>
      %cst_38 = arith.constant dense<0.000000e+00> : vector<64x128xf32>
      %52 = tpu.matmul %50, %51, %cst_38 {dimension_numbers = #tpu.dot_dimension_numbers<[1], [0], [0], [1], [0, 0, 1, 1], [], []>} : vector<64x32xbf16>, vector<32x128xbf16>, vector<64x128xf32> -> vector<64x128xf32>
      %c0_39 = arith.constant 0 : index
      %c0_40 = arith.constant 0 : index
      %53 = vector.load %arg6[%c0_39, %c0_40] : memref<1x128xf32, #tpu.memory_space<vmem>>, vector<1x128xf32>
      %54 = vector.broadcast %53 : vector<1x128xf32> to vector<64x128xf32>
      %55 = arith.addf %52, %54 : vector<64x128xf32>
      %56 = arith.truncf %55 : vector<64x128xf32> to vector<64x128xbf16>
      %c0_41 = arith.constant 0 : index
      %c0_42 = arith.constant 0 : index
      %57 = vector.load %arg15[%c0_41, %c0_42] : memref<64x128xbf16, #tpu.memory_space<vmem>>, vector<64x128xbf16>
      tpu.vector_store %arg15[%c0_41, %c0_42], %56 {strides = array<i32>} : memref<64x128xbf16, #tpu.memory_space<vmem>>, vector<64x128xbf16>,
      %cst_43 = arith.constant 0xFF800000 : f32
      %58 = vector.broadcast %cst_43 : f32 to vector<64x1xf32>
      %c0_44 = arith.constant 0 : index
      %c0_45 = arith.constant 0 : index
      %59 = vector.load %arg16[%c0_44, %c0_45] : memref<64x1xf32, #tpu.memory_space<vmem>>, vector<64x1xf32>
      tpu.vector_store %arg16[%c0_44, %c0_45], %58 {strides = array<i32>} : memref<64x1xf32, #tpu.memory_space<vmem>>, vector<64x1xf32>,
      %cst_46 = arith.constant 0.000000e+00 : f32
      %60 = vector.broadcast %cst_46 : f32 to vector<64x1xf32>
      %c0_47 = arith.constant 0 : index
      %c0_48 = arith.constant 0 : index
      %61 = vector.load %arg17[%c0_47, %c0_48] : memref<64x1xf32, #tpu.memory_space<vmem>>, vector<64x1xf32>
      tpu.vector_store %arg17[%c0_47, %c0_48], %60 {strides = array<i32>} : memref<64x1xf32, #tpu.memory_space<vmem>>, vector<64x1xf32>,
      %cst_49 = arith.constant 0.000000e+00 : f32
      %62 = vector.broadcast %cst_49 : f32 to vector<64x32xf32>
      %c0_50 = arith.constant 0 : index
      %c0_51 = arith.constant 0 : index
      %63 = vector.load %arg18[%c0_50, %c0_51] : memref<64x32xf32, #tpu.memory_space<vmem>>, vector<64x32xf32>
      tpu.vector_store %arg18[%c0_50, %c0_51], %62 {strides = array<i32>} : memref<64x32xf32, #tpu.memory_space<vmem>>, vector<64x32xf32>,
    } else {
    }
    %c0 = arith.constant 0 : index
    %c0_1 = arith.constant 0 : index
    %c0_2 = arith.constant 0 : index
    %3 = vector.load %arg4[%c0, %c0_1, %c0_2] : memref<1x64x32xf32, #tpu.memory_space<vmem>>, vector<1x64x32xf32>
    %4 = vector.shape_cast %3 : vector<1x64x32xf32> to vector<64x32xf32>
    %5 = arith.truncf %4 : vector<64x32xf32> to vector<64x32xbf16>
    %c0_3 = arith.constant 0 : index
    %c0_4 = arith.constant 0 : index
    %6 = vector.load %arg7[%c0_3, %c0_4] : memref<32x128xbf16, #tpu.memory_space<vmem>>, vector<32x128xbf16>
    %cst = arith.constant dense<0.000000e+00> : vector<64x128xf32>
    %7 = tpu.matmul %5, %6, %cst {dimension_numbers = #tpu.dot_dimension_numbers<[1], [0], [0], [1], [0, 0, 1, 1], [], []>} : vector<64x32xbf16>, vector<32x128xbf16>, vector<64x128xf32> -> vector<64x128xf32>
    %c0_5 = arith.constant 0 : index
    %c0_6 = arith.constant 0 : index
    %8 = vector.load %arg8[%c0_5, %c0_6] : memref<1x128xf32, #tpu.memory_space<vmem>>, vector<1x128xf32>
    %9 = vector.broadcast %8 : vector<1x128xf32> to vector<64x128xf32>
    %10 = arith.addf %7, %9 : vector<64x128xf32>
    %c0_7 = arith.constant 0 : index
    %c0_8 = arith.constant 0 : index
    %11 = vector.load %arg9[%c0_7, %c0_8] : memref<32x32xbf16, #tpu.memory_space<vmem>>, vector<32x32xbf16>
    %cst_9 = arith.constant dense<0.000000e+00> : vector<64x32xf32>
    %12 = tpu.matmul %5, %11, %cst_9 {dimension_numbers = #tpu.dot_dimension_numbers<[1], [0], [0], [1], [0, 0, 1, 1], [], []>} : vector<64x32xbf16>, vector<32x32xbf16>, vector<64x32xf32> -> vector<64x32xf32>
    %c0_10 = arith.constant 0 : index
    %c0_11 = arith.constant 0 : index
    %13 = vector.load %arg10[%c0_10, %c0_11] : memref<1x32xf32, #tpu.memory_space<vmem>>, vector<1x32xf32>
    %14 = vector.broadcast %13 : vector<1x32xf32> to vector<64x32xf32>
    %15 = arith.addf %12, %14 : vector<64x32xf32>
    %c0_12 = arith.constant 0 : index
    %c0_13 = arith.constant 0 : index
    %16 = vector.load %arg15[%c0_12, %c0_13] : memref<64x128xbf16, #tpu.memory_space<vmem>>, vector<64x128xbf16>
    %17 = arith.truncf %10 : vector<64x128xf32> to vector<64x128xbf16>
    %cst_14 = arith.constant dense<0.000000e+00> : vector<64x64xf32>
    %18 = tpu.matmul %16, %17, %cst_14 {dimension_numbers = #tpu.dot_dimension_numbers<[1], [1], [0], [0], [0, 0, 1, 0], [], []>} : vector<64x128xbf16>, vector<64x128xbf16>, vector<64x64xf32> -> vector<64x64xf32>
    %cst_15 = arith.constant 0.176776692 : f32
    %19 = vector.broadcast %cst_15 : f32 to vector<64x64xf32>
    %20 = arith.mulf %18, %19 : vector<64x64xf32>
    %c0_16 = arith.constant 0 : index
    %c0_17 = arith.constant 0 : index
    %21 = vector.load %arg16[%c0_16, %c0_17] : memref<64x1xf32, #tpu.memory_space<vmem>>, vector<64x1xf32>
    %cst_18 = arith.constant dense<0xFF800000> : vector<64xf32>
    %22 = vector.multi_reduction <maximumf>, %20, %cst_18 [1] : vector<64x64xf32> to vector<64xf32>
    %23 = vector.shape_cast %22 : vector<64xf32> to vector<64x1xf32>
    %24 = arith.maximumf %21, %23 : vector<64x1xf32>
    %25 = arith.subf %21, %24 : vector<64x1xf32>
    %26 = math.exp %25 : vector<64x1xf32>
    %27 = vector.broadcast %24 : vector<64x1xf32> to vector<64x64xf32>
    %28 = arith.subf %20, %27 : vector<64x64xf32>
    %29 = math.exp %28 : vector<64x64xf32>
    %c0_19 = arith.constant 0 : index
    %c0_20 = arith.constant 0 : index
    %30 = vector.load %arg17[%c0_19, %c0_20] : memref<64x1xf32, #tpu.memory_space<vmem>>, vector<64x1xf32>
    %31 = arith.mulf %26, %30 : vector<64x1xf32>
    %cst_21 = arith.constant dense<0.000000e+00> : vector<64xf32>
    %32 = vector.multi_reduction <add>, %29, %cst_21 [1] : vector<64x64xf32> to vector<64xf32>
    %33 = vector.shape_cast %32 : vector<64xf32> to vector<64x1xf32>
    %34 = arith.addf %31, %33 : vector<64x1xf32>
    %c0_22 = arith.constant 0 : index
    %c0_23 = arith.constant 0 : index
    %35 = vector.load %arg17[%c0_22, %c0_23] : memref<64x1xf32, #tpu.memory_space<vmem>>, vector<64x1xf32>
    tpu.vector_store %arg17[%c0_22, %c0_23], %34 {strides = array<i32>} : memref<64x1xf32, #tpu.memory_space<vmem>>, vector<64x1xf32>,
    %c0_24 = arith.constant 0 : index
    %c0_25 = arith.constant 0 : index
    %36 = vector.load %arg18[%c0_24, %c0_25] : memref<64x32xf32, #tpu.memory_space<vmem>>, vector<64x32xf32>
    %37 = vector.broadcast %26 : vector<64x1xf32> to vector<64x32xf32>
    %38 = arith.mulf %37, %36 : vector<64x32xf32>
    %39 = arith.truncf %29 : vector<64x64xf32> to vector<64x64xbf16>
    %40 = arith.truncf %15 : vector<64x32xf32> to vector<64x32xbf16>
    %cst_26 = arith.constant dense<0.000000e+00> : vector<64x32xf32>
    %41 = tpu.matmul %39, %40, %cst_26 {dimension_numbers = #tpu.dot_dimension_numbers<[1], [0], [0], [1], [0, 0, 1, 1], [], []>} : vector<64x64xbf16>, vector<64x32xbf16>, vector<64x32xf32> -> vector<64x32xf32>
    %42 = arith.addf %38, %41 : vector<64x32xf32>
    %c0_27 = arith.constant 0 : index
    %c0_28 = arith.constant 0 : index
    %43 = vector.load %arg18[%c0_27, %c0_28] : memref<64x32xf32, #tpu.memory_space<vmem>>, vector<64x32xf32>
    tpu.vector_store %arg18[%c0_27, %c0_28], %42 {strides = array<i32>} : memref<64x32xf32, #tpu.memory_space<vmem>>, vector<64x32xf32>,
    %c0_29 = arith.constant 0 : index
    %c0_30 = arith.constant 0 : index
    %44 = vector.load %arg16[%c0_29, %c0_30] : memref<64x1xf32, #tpu.memory_space<vmem>>, vector<64x1xf32>
    tpu.vector_store %arg16[%c0_29, %c0_30], %24 {strides = array<i32>} : memref<64x1xf32, #tpu.memory_space<vmem>>, vector<64x1xf32>,
    %c0_i32_31 = arith.constant 0 : i32
    %45 = arith.cmpi eq, %arg2, %c0_i32_31 : i32
    %46 = arith.extui %45 : i1 to i32
    %c0_i32_32 = arith.constant 0 : i32
    %47 = arith.cmpi ne, %46, %c0_i32_32 : i32
    scf.if %47 {
      %c0_33 = arith.constant 0 : index
      %c0_34 = arith.constant 0 : index
      %48 = vector.load %arg18[%c0_33, %c0_34] : memref<64x32xf32, #tpu.memory_space<vmem>>, vector<64x32xf32>
      %c0_35 = arith.constant 0 : index
      %c0_36 = arith.constant 0 : index
      %49 = vector.load %arg17[%c0_35, %c0_36] : memref<64x1xf32, #tpu.memory_space<vmem>>, vector<64x1xf32>
      %50 = tpu.reciprocal %49 {approx = true} : vector<64x1xf32> -> vector<64x1xf32>
      %51 = vector.broadcast %50 : vector<64x1xf32> to vector<64x32xf32>
      %52 = arith.mulf %48, %51 : vector<64x32xf32>
      %c0_37 = arith.constant 0 : index
      %c0_38 = arith.constant 0 : index
      %c0_39 = arith.constant 0 : index
      %53 = vector.load %arg3[%c0_37, %c0_38, %c0_39] : memref<1x64x32xf32, #tpu.memory_space<vmem>>, vector<1x64x32xf32>
      %54 = vector.shape_cast %53 : vector<1x64x32xf32> to vector<64x32xf32>
      %c0_40 = arith.constant 0 : index
      %55 = memref.load %arg11[%c0_40] : memref<1xf32, #tpu.memory_space<smem>>
      %56 = vector.broadcast %55 : f32 to vector<64x32xf32>
      %57 = arith.mulf %56, %52 : vector<64x32xf32>
      %58 = arith.addf %57, %54 : vector<64x32xf32>
      %cst_41 = arith.constant dense<0.000000e+00> : vector<64xf32>
      %59 = vector.multi_reduction <add>, %58, %cst_41 [1] : vector<64x32xf32> to vector<64xf32>
      %60 = vector.shape_cast %59 : vector<64xf32> to vector<64x1xf32>
      %cst_42 = arith.constant 3.200000e+01 : f32
      %61 = vector.broadcast %cst_42 : f32 to vector<64x1xf32>
      %62 = arith.divf %60, %61 : vector<64x1xf32>
      %63 = vector.broadcast %62 : vector<64x1xf32> to vector<64x32xf32>
      %64 = arith.subf %58, %63 : vector<64x32xf32>
      %65 = arith.mulf %64, %64 : vector<64x32xf32>
      %cst_43 = arith.constant dense<0.000000e+00> : vector<64xf32>
      %66 = vector.multi_reduction <add>, %65, %cst_43 [1] : vector<64x32xf32> to vector<64xf32>
      %67 = vector.shape_cast %66 : vector<64xf32> to vector<64x1xf32>
      %cst_44 = arith.constant 3.200000e+01 : f32
      %68 = vector.broadcast %cst_44 : f32 to vector<64x1xf32>
      %69 = arith.divf %67, %68 : vector<64x1xf32>
      %cst_45 = arith.constant 9.99999974E-6 : f32
      %70 = vector.broadcast %cst_45 : f32 to vector<64x1xf32>
      %71 = arith.addf %69, %70 : vector<64x1xf32>
      %72 = math.rsqrt %71 : vector<64x1xf32>
      %73 = vector.broadcast %72 : vector<64x1xf32> to vector<64x32xf32>
      %74 = arith.mulf %64, %73 : vector<64x32xf32>
      %c0_46 = arith.constant 0 : index
      %c0_47 = arith.constant 0 : index
      %75 = vector.load %arg12[%c0_46, %c0_47] : memref<1x32xf32, #tpu.memory_space<vmem>>, vector<1x32xf32>
      %76 = vector.broadcast %75 : vector<1x32xf32> to vector<64x32xf32>
      %77 = arith.mulf %74, %76 : vector<64x32xf32>
      %c0_48 = arith.constant 0 : index
      %c0_49 = arith.constant 0 : index
      %78 = vector.load %arg13[%c0_48, %c0_49] : memref<1x32xf32, #tpu.memory_space<vmem>>, vector<1x32xf32>
      %79 = vector.broadcast %78 : vector<1x32xf32> to vector<64x32xf32>
      %80 = arith.addf %77, %79 : vector<64x32xf32>
      %c0_50 = arith.constant 0 : index
      %c0_51 = arith.constant 0 : index
      %c0_52 = arith.constant 0 : index
      %81 = vector.load %arg14[%c0_50, %c0_51, %c0_52] : memref<1x64x32xf32, #tpu.memory_space<vmem>>, vector<1x64x32xf32>
      %82 = vector.shape_cast %81 : vector<1x64x32xf32> to vector<64x32xf32>
      %83 = vector.shape_cast %80 : vector<64x32xf32> to vector<1x64x32xf32>
      tpu.vector_store %arg14[%c0_50, %c0_51, %c0_52], %83 {strides = array<i32>} : memref<1x64x32xf32, #tpu.memory_space<vmem>>, vector<1x64x32xf32>,
    } else {
    }
    return
  }
  func.func @transform_0(%arg0: i32, %arg1: i32, %arg2: i32) -> (i32, i32, i32) {
    %c0_i32 = arith.constant 0 : i32
    %c0_i32_0 = arith.constant 0 : i32
    return %arg0, %arg1, %c0_i32 : i32, i32, i32
  }
  func.func @transform_1(%arg0: i32, %arg1: i32, %arg2: i32) -> (i32, i32, i32) {
    %c0_i32 = arith.constant 0 : i32
    %c0_i32_0 = arith.constant 0 : i32
    return %arg0, %arg2, %c0_i32 : i32, i32, i32
  }
  func.func @transform_2(%arg0: i32, %arg1: i32, %arg2: i32) -> (i32, i32) {
    %c0_i32 = arith.constant 0 : i32
    %c0_i32_0 = arith.constant 0 : i32
    %c0_i32_1 = arith.constant 0 : i32
    return %c0_i32, %c0_i32_0 : i32, i32
  }
  func.func @transform_3(%arg0: i32, %arg1: i32, %arg2: i32) -> (i32, i32) {
    %c0_i32 = arith.constant 0 : i32
    %c0_i32_0 = arith.constant 0 : i32
    %c0_i32_1 = arith.constant 0 : i32
    return %c0_i32, %c0_i32_0 : i32, i32
  }
  func.func @transform_4(%arg0: i32, %arg1: i32, %arg2: i32) -> (i32, i32) {
    %c0_i32 = arith.constant 0 : i32
    %c0_i32_0 = arith.constant 0 : i32
    %c0_i32_1 = arith.constant 0 : i32
    return %c0_i32, %c0_i32_0 : i32, i32
  }
  func.func @transform_5(%arg0: i32, %arg1: i32, %arg2: i32) -> (i32, i32) {
    %c0_i32 = arith.constant 0 : i32
    %c0_i32_0 = arith.constant 0 : i32
    %c0_i32_1 = arith.constant 0 : i32
    return %c0_i32, %c0_i32_0 : i32, i32
  }
  func.func @transform_6(%arg0: i32, %arg1: i32, %arg2: i32) -> (i32, i32) {
    %c0_i32 = arith.constant 0 : i32
    %c0_i32_0 = arith.constant 0 : i32
    %c0_i32_1 = arith.constant 0 : i32
    return %c0_i32, %c0_i32_0 : i32, i32
  }
  func.func @transform_7(%arg0: i32, %arg1: i32, %arg2: i32) -> (i32, i32) {
    %c0_i32 = arith.constant 0 : i32
    %c0_i32_0 = arith.constant 0 : i32
    %c0_i32_1 = arith.constant 0 : i32
    return %c0_i32, %c0_i32_0 : i32, i32
  }
  func.func @transform_8(%arg0: i32, %arg1: i32, %arg2: i32) -> i32 {
    %c0_i32 = arith.constant 0 : i32
    %c0_i32_0 = arith.constant 0 : i32
    return %c0_i32 : i32
  }
  func.func @transform_9(%arg0: i32, %arg1: i32, %arg2: i32) -> (i32, i32) {
    %c0_i32 = arith.constant 0 : i32
    %c0_i32_0 = arith.constant 0 : i32
    %c0_i32_1 = arith.constant 0 : i32
    return %c0_i32, %c0_i32_0 : i32, i32
  }
  func.func @transform_10(%arg0: i32, %arg1: i32, %arg2: i32) -> (i32, i32) {
    %c0_i32 = arith.constant 0 : i32
    %c0_i32_0 = arith.constant 0 : i32
    %c0_i32_1 = arith.constant 0 : i32
    return %c0_i32, %c0_i32_0 : i32, i32
  }
  func.func @transform_11(%arg0: i32, %arg1: i32, %arg2: i32) -> (i32, i32, i32) {
    %c0_i32 = arith.constant 0 : i32
    %c0_i32_0 = arith.constant 0 : i32
    return %arg0, %arg1, %c0_i32 : i32, i32, i32
  }
}

</mosaic_0001>

<bundles_post_ra>
// kernel: tpu_custom_call.1
= control target key start
LH: loop header
LB: loop body
LE: loop exit
PB: predicated region body
PF: predicated region fallthrough
CT: control target
= control target key end

     0   :  { %s2047_s19 = smov 0   ;;  %s2049_s20 = smov 0   ;;  %s2457_s0 = inlined_call_operand.vmem [shape: f32[2,64,32], index: 0, kind: input, shape index: {}]   ;;  %s2458_s1 = inlined_call_operand.vmem [shape: f32[2,64,32], index: 1, kind: input, shape index: {}]   ;;  %s2459_s2 = inlined_call_operand.vmem [shape: bf16[32,128], index: 2, kind: input, shape index: {}]   ;;  %s2460_s3 = inlined_call_operand.vmem [shape: f32[1,128], index: 3, kind: input, shape index: {}]   ;;  %s2461_s4 = inlined_call_operand.vmem [shape: bf16[32,128], index: 4, kind: input, shape index: {}]   ;;  %s2462_s5 = inlined_call_operand.vmem [shape: f32[1,128], index: 5, kind: input, shape index: {}]   ;;  %s2463_s6 = inlined_call_operand.vmem [shape: bf16[32,32], index: 6, kind: input, shape index: {}]   ;;  %s2464_s7 = inlined_call_operand.vmem [shape: f32[1,32], index: 7, kind: input, shape index: {}]   ;;  %s2465_s8 = inlined_call_operand.<no memory space> [shape: f32[1], index: 8, kind: input, shape index: {}]   ;;  %s2466_s9 = inlined_call_operand.vmem [shape: f32[1,32], index: 9, kind: input, shape index: {}]   ;;  %s2467_s10 = inlined_call_operand.vmem [shape: f32[1,32], index: 10, kind: input, shape index: {}]   ;;  %s2468_s11 = inlined_call_operand.vmem [shape: f32[2,64,32], index: 11, kind: output, shape index: {}]  }
   0x1   :  { %16 = sst [smem:[#allocation6]] %s2465_s8  ;;  %s2051_s21 = smov 0  }
   0x2 LB: > { %s41_s8 = sadd.s32 1, %s1975_s20  ;;  %p1670_p0 = scmp.ge.s32.totalorder %s1979_s21, 1  ;;  %s1979_s21 = sphi %s2051_s21, %s22_s21   ;;  %s1975_s20 = sphi %s2049_s20, %s2470_s20   ;;  %s1971_s19 = sphi %s2047_s19, %s2469_s19  }
   0x3   : > { %p43_p1 = scmp.ge.s32.totalorder %s41_s8, 2  ;;  %p383_p2 = scmp.lt.s32.totalorder %s1979_s21, 3 }
   0x5   : > { %s2472_s8 = smov (%p43_p1, %s41_s8), 0  ;;  %p384_p3 = pnand %p1670_p0, %p383_p2 }
   0x6   : > { %p441_p4 = scmp.lt.s32.totalorder (!%p384_p3), %s1971_s19, 1  ;;  %s1397_s12 = sld [smem:[#allocation6]] (!%p384_p3) }
   0x7   : > { %387 = sbr.rel (%p384_p3) target bundleno = 1369 (0x559), region = 64 }
   0xc   : > { %v1883_v0 = vld [vmem:[%s2461_s4 + $0x8] sm:$0xff]   ;;  %v1884_v1 = vld [vmem:[%s2461_s4] sm:$0xff]   ;;  %s2474_s19 = smov (!%p441_p4, %s1971_s19), 1  ;;  %vm510_vm0 = vcmask 261120   ;;  %vm628_vm1 = vcmask 7168   ;;  %vm971_vm2 = vcmask 523264  }
   0xd   : > { %1798 = vmatprep.subr.bf16.mxu1 %v1883_v0  ;;  %v1885_v2 = vld [vmem:[%s2459_s2 + $0x8] sm:$0xff]   ;;  %v1886_v3 = vld [vmem:[%s2459_s2] sm:$0xff]   ;;  %s2077_s30 = sshll.u32 %s2474_s19, 6 }
   0xe   : > { %1799 = vmatpush3.bf16.msra.mxu1 %v1883_v0  ;;  %1786 = vmatprep.subr.bf16.mxu0 %v1885_v2  ;;  %s2083_s14 = scalar_lea.vmem %s2457_s0, %s2077_s30  ;;  %s458_s17 = scalar_lea.vmem %s2458_s1, %s2077_s30  ;;  %v1677_v31 = vld [vmem:[%s2460_s3] ss:$0 sm:$0xff] }
   0xf   : > { %1800 = vmatprep.subr.bf16.mxu1 %v1884_v1  ;;  %1787 = vmatpush3.bf16.msra.mxu0 %v1885_v2  ;;  %v653_v4 = vld [vmem:[%s458_s17] sm:$0xff]  ;;  %v654_v5 = vld [vmem:[%s458_s17 + $0x8] sm:$0xff]  ;;  %v655_v6 = vld [vmem:[%s458_s17 + $0x10] sm:$0xff]  ;;  %s2423_s19 = scalar_lea.vmem %s2468_s11, %s2077_s30 }
  0x10   : > { %1788 = vmatprep.subr.bf16.mxu0 %v1886_v3  ;;  %v661_v7 = vpack.c.bf16 %v654_v5, %v653_v4  ;;  %v656_v8 = vld [vmem:[%s458_s17 + $0x18] sm:$0xff]  ;;  %v657_v9 = vld [vmem:[%s458_s17 + $0x20] sm:$0xff]  ;;  %v658_v10 = vld [vmem:[%s458_s17 + $0x28] sm:$0xff] }
  0x11   : > { %v2089_v11 = vpack.c.bf16 %v656_v8, %v655_v6  ;;  %v2091_v12 = vpack.c.bf16 %v658_v10, %v657_v9  ;;  %v2094_v13 = vld [vmem:[%s2083_s14] sm:$0xff]  ;;  %v2098_v14 = vld [vmem:[%s2083_s14 + $0x8] sm:$0xff]  ;;  %v2101_v15 = vld [vmem:[%s2083_s14 + $0x10] sm:$0xff] }
  0x12   : > { %1801 = vmatpush3.bf16.msra.mxu1 %v1884_v1  ;;  %1802 = vmatprep.mubr.msk.bf16.mxu1 %vm510_vm0, %v661_v7  ;;  %v2104_v16 = vld [vmem:[%s2083_s14 + $0x18] sm:$0xff]  ;;  %v483_v17 = vpack.c.bf16 %v2098_v14, %v2094_v13  ;;  %v2113_v19 = vld [vmem:[%s2083_s14 + $0x20] sm:$0xff]  ;;  %v2116_v20 = vld [vmem:[%s2083_s14 + $0x28] sm:$0xff] }
  0x13   : > { %1789 = vmatpush3.bf16.msra.mxu0 %v1886_v3  ;;  %v484_v18 = vpack.c.bf16 %v2104_v16, %v2101_v15  ;;  %v659_v21 = vld [vmem:[%s458_s17 + $0x30] sm:$0xff]  ;;  %v660_v22 = vld [vmem:[%s458_s17 + $0x38] sm:$0xff]  ;;  %v485_v23 = vpack.c.bf16 %v2116_v20, %v2113_v19  ;;  %v1692_v45 = vld [vmem:[%s2462_s5] ss:$0 sm:$0xff] }
  0x14   : > { %1790 = vmatprep.mubr.msk.bf16.mxu0 %vm510_vm0, %v483_v17  ;;  %v2124_v24 = vpack.c.bf16 %v660_v22, %v659_v21  ;;  %v2128_v25 = vld [vmem:[%s2083_s14 + $0x30] sm:$0xff]  ;;  %v2131_v26 = vld [vmem:[%s2083_s14 + $0x38] sm:$0xff]  ;;  %v1891_v10 = vld [vmem:[%s2463_s6 + $0x8] sm:$0xff]  }
  0x15   : > { %1803 = vmatmul.mubr.msk.bf16.vlgmr.msra.gmra.mxu1 %vm510_vm0, %v2089_v11  ;;  %v486_v27 = vpack.c.bf16 %v2131_v26, %v2128_v25  ;;  %v1892_v17 = vld [vmem:[%s2463_s6] sm:$0xff]   ;;  %1810 = vmatprep.subr.bf16.mxu0 %v1891_v10 }
  0x16   : > { %1806 = vmatprep.mubr.msk.bf16.mxu1 %vm510_vm0, %v2091_v12  ;;  %1791 = vmatmul.mubr.msk.bf16.vlgmr.msra.gmra.mxu0 %vm510_vm0, %v484_v18  ;;  %v1981_v18 = vmov -inf  }
  0x17   : > { %1794 = vmatprep.mubr.msk.bf16.mxu0 %vm510_vm0, %v485_v23  ;;  %631 = vst.msk [vmem:[#allocation3 + $0x10] sm:$0xff] %vm628_vm1, %v1981_v18  ;;  %629 = vst.msk [vmem:[#allocation3] sm:$0xff] %vm628_vm1, %v1981_v18  ;;  %1811 = vmatpush3.bf16.msra.mxu0 %v1891_v10 }
  0x18   : > { %630 = vst.msk [vmem:[#allocation3 + $0x8] sm:$0xff] %vm628_vm1, %v1981_v18  ;;  %632 = vst.msk [vmem:[#allocation3 + $0x18] sm:$0xff] %vm628_vm1, %v1981_v18  ;;  %1812 = vmatprep.subr.bf16.mxu0 %v1892_v17 }
  0x19   : > { %633 = vst.msk [vmem:[#allocation3 + $0x20] sm:$0xff] %vm628_vm1, %v1981_v18  ;;  %634 = vst.msk [vmem:[#allocation3 + $0x28] sm:$0xff] %vm628_vm1, %v1981_v18 }
  0x1a   : > { %635 = vst.msk [vmem:[#allocation3 + $0x30] sm:$0xff] %vm628_vm1, %v1981_v18  ;;  %636 = vst.msk [vmem:[#allocation3 + $0x38] sm:$0xff] %vm628_vm1, %v1981_v18 }
  0x1b   : > { %1813 = vmatpush3.bf16.msra.mxu0 %v1892_v17 }
  0x1d   : > { %1807 = vmatmul.mubr.msk.bf16.gmra.mxu1 %vm510_vm0, %v2124_v24 }
  0x1e   : > { %1795 = vmatmul.mubr.msk.bf16.gmra.mxu0 %vm510_vm0, %v486_v27 }
  0x1f   : > { %1814 = vmatprep.mubr.msk.bf16.mxu0 %vm510_vm0, %v661_v7 }
  0x21   : > { %v2261_v18 = vld [vmem:[#allocation3 + $0x30] sm:$0xff] }
  0x26   : > { %1815 = vmatmul.mubr.msk.bf16.vlgmr.msra.gmra.mxu0 %vm510_vm0, %v2089_v11 }
  0x27   : > { %1818 = vmatprep.mubr.msk.bf16.mxu0 %vm510_vm0, %v2091_v12 }
  0x2e   : > { %1819 = vmatmul.mubr.msk.bf16.gmra.mxu0 %vm510_vm0, %v2124_v24 }
  0xd5   : > { %v1804_v28 = vpop.f32.mrf.mxu1 }
  0xd6   : > { %v1792_v30 = vpop.f32.mrf.mxu0  ;;  %v744_v2 = vadd.f32 %v1804_v28, %v1692_v45 }
  0xd7   : > { %v735_v29 = vpop.f32.mrf.mxu1  ;;  %v566_v35 = vadd.f32 %v1792_v30, %v1677_v31 }
  0xd8   : > { %v557_v33 = vpop.f32.mrf.mxu0  ;;  %v736_v5 = vadd.f32 %v1692_v45, %v735_v29 }
  0xd9   : > { %v1805_v32 = vpop.f32.mrf.mxu1  ;;  %v558_v38 = vadd.f32 %v1677_v31, %v557_v33 }
  0xda   : > { %v1793_v36 = vpop.f32.mrf.mxu0  ;;  %v747_v0 = vadd.f32 %v1805_v32, %v1692_v45 }
  0xdb   : > { %v738_v34 = vpop.f32.mrf.mxu1  ;;  %v569_v39 = vadd.f32 %v1793_v36, %v1677_v31 }
  0xdc   : > { %v560_v40 = vpop.f32.mrf.mxu0  ;;  %v863_v3 = vpack.c.bf16 %v747_v0, %v744_v2  ;;  %v739_v4 = vadd.f32 %v1692_v45, %v738_v34 }
  0xdd   : > { %v1808_v37 = vpop.f32.mrf.mxu1  ;;  %v1737_v42 = vpack.c.bf16 %v569_v39, %v566_v35  ;;  %v561_v43 = vadd.f32 %v1677_v31, %v560_v40 }
  0xde   : > { %v1796_v44 = vpop.f32.mrf.mxu0  ;;  %v760_v48 = vadd.f32 %v1808_v37, %v1692_v45  ;;  %v862_v6 = vpack.c.bf16 %v739_v4, %v736_v5  ;;  %v2251_v5 = vld [vmem:[#allocation3 + $0x20] sm:$0xff] }
  0xdf   : > { %v751_v41 = vpop.f32.mrf.mxu1  ;;  %1749 = vst [vmem:[#allocation2 + $0x8] sm:$0xff] %v1737_v42   ;;  %v1732_v47 = vpack.c.bf16 %v561_v43, %v558_v38  ;;  %v582_v52 = vadd.f32 %v1796_v44, %v1677_v31 }
  0xe0   : > { %v573_v50 = vpop.f32.mrf.mxu0  ;;  %v752_v53 = vadd.f32 %v1692_v45, %v751_v41  ;;  %v1982_v41 = vmov 0  }
  0xe1   : > { %v1809_v46 = vpop.f32.mrf.mxu1  ;;  %1733 = vst [vmem:[#allocation2] sm:$0xff] %v1732_v47   ;;  %v574_v57 = vadd.f32 %v1677_v31, %v573_v50  ;;  %1882 = vset.pattern.permute.xlu1 %v1982_v41  ;;  %1881 = vset.pattern.permute.xlu0 %v1982_v41  ;;  %v2275_v41 = vld [vmem:[#allocation3 + $0x38] sm:$0xff] }
  0xe2   : > { %v763_v49 = vadd.f32 %v1809_v46, %v1692_v45  ;;  %v1797_v56 = vpop.f32.mrf.mxu0  ;;  %v1983_v46 = vmov 0.0  }
  0xe3   : > { %v754_v51 = vpop.f32.mrf.mxu1  ;;  %v585_v58 = vadd.f32 %v1797_v56, %v1677_v31  ;;  %639 = vst.msk [vmem:[#allocation4 + $0x10] sm:$0xff] %vm628_vm1, %v1983_v46  ;;  %637 = vst.msk [vmem:[#allocation4] sm:$0xff] %vm628_vm1, %v1983_v46 }
  0xe4   : > { %v865_v54 = vpack.c.bf16 %v763_v49, %v760_v48  ;;  %v755_v55 = vadd.f32 %v1692_v45, %v754_v51  ;;  %v576_v60 = vpop.f32.mrf.mxu0  ;;  %638 = vst.msk [vmem:[#allocation4 + $0x8] sm:$0xff] %vm628_vm1, %v1983_v46  ;;  %640 = vst.msk [vmem:[#allocation4 + $0x18] sm:$0xff] %vm628_vm1, %v1983_v46  ;;  %v2213_v49 = vld [vmem:[#allocation3 + $0x10] sm:$0xff]  ;;  %v2215_v51 = vld [vmem:[#allocation3] sm:$0xff] }
  0xe5   : > { %v1747_v61 = vpack.c.bf16 %v585_v58, %v582_v52  ;;  %v577_v62 = vadd.f32 %v1677_v31, %v576_v60  ;;  %641 = vst.msk [vmem:[#allocation4 + $0x20] sm:$0xff] %vm628_vm1, %v1983_v46  ;;  %642 = vst.msk [vmem:[#allocation4 + $0x28] sm:$0xff] %vm628_vm1, %v1983_v46  ;;  %v2230_v60 = vld [vmem:[#allocation3 + $0x8] sm:$0xff] }
  0xe6   : > { %v864_v59 = vpack.c.bf16 %v755_v55, %v752_v53  ;;  %1822 = vmatprep.subr.bf16.mxu1 %v865_v54  ;;  %v1888_v8 = vld [vmem:[#allocation2 + $0x8] sm:$0xff]   ;;  %643 = vst.msk [vmem:[#allocation4 + $0x30] sm:$0xff] %vm628_vm1, %v1983_v46  ;;  %644 = vst.msk [vmem:[#allocation4 + $0x38] sm:$0xff] %vm628_vm1, %v1983_v46  ;;  %v1816_v47 = vpop.f32.mrf.mxu0  ;;  %v2220_v55 = vld [vmem:[#allocation3 + $0x18] sm:$0xff] }
  0xe7   : > { %1823 = vmatpush3.bf16.xpose.msra.mxu1 %v865_v54  ;;  %1751 = vst [vmem:[#allocation2 + $0x18] sm:$0xff] %v1747_v61   ;;  %v1742_v63 = vpack.c.bf16 %v577_v62, %v574_v57  ;;  %645 = vst.msk [vmem:[#allocation5] sm:$0xff] %vm510_vm0, %v1983_v46 }
  0xe8   : > { %1824 = vmatprep.subr.bf16.mxu1 %v864_v59  ;;  %v1887_v1 = vld [vmem:[#allocation2] sm:$0xff]   ;;  %646 = vst.msk [vmem:[#allocation5 + $0x8] sm:$0xff] %vm510_vm0, %v1983_v46  ;;  %647 = vst.msk [vmem:[#allocation5 + $0x10] sm:$0xff] %vm510_vm0, %v1983_v46  ;;  %v823_v48 = vpop.f32.mrf.mxu0 }
  0xe9   : > { %1750 = vst [vmem:[#allocation2 + $0x10] sm:$0xff] %v1742_v63   ;;  %1830 = vmatprep.mubr.bf16.mxu1 %v1887_v1  ;;  %648 = vst.msk [vmem:[#allocation5 + $0x18] sm:$0xff] %vm510_vm0, %v1983_v46  ;;  %v1699_v1 = vld [vmem:[%s2464_s7] ss:$0 sm:$0xff] }
  0xea   : > { %649 = vst.msk [vmem:[#allocation5 + $0x20] sm:$0xff] %vm510_vm0, %v1983_v46  ;;  %650 = vst.msk [vmem:[#allocation5 + $0x28] sm:$0xff] %vm510_vm0, %v1983_v46  ;;  %v1817_v52 = vpop.f32.mrf.mxu0 }
  0xeb   : > { %651 = vst.msk [vmem:[#allocation5 + $0x30] sm:$0xff] %vm510_vm0, %v1983_v46  ;;  %652 = vst.msk [vmem:[#allocation5 + $0x38] sm:$0xff] %vm510_vm0, %v1983_v46 }
  0xec   : > { %v826_v56 = vpop.f32.mrf.mxu0 }
  0xee   : > { %v1890_v9 = vld [vmem:[#allocation2 + $0x18] sm:$0xff]   ;;  %v1820_v61 = vpop.f32.mrf.mxu0 }
  0xef   : > { %1825 = vmatpush3.bf16.xpose.msra.mxu1 %v864_v59 }
  0xf0   : > { %1826 = vmatprep.subr.bf16.mxu1 %v863_v3  ;;  %v1889_v7 = vld [vmem:[#allocation2 + $0x10] sm:$0xff]   ;;  %v839_v2 = vpop.f32.mrf.mxu0 }
  0xf7   : > { %1827 = vmatpush3.bf16.xpose.msra.mxu1 %v863_v3 }
  0xf8   : > { %1828 = vmatprep.subr.bf16.mxu1 %v862_v6 }
  0xff   : > { %1829 = vmatpush3.bf16.xpose.msra.mxu1 %v862_v6  ;;  %v1821_v6 = vpop.f32.mrf.mxu0 }
 0x100   : > { %v851_v10 = vadd.f32 %v1821_v6, %v1699_v1 }
 0x106   : > { %1831 = vmatmul.mubr.bf16.vlgmr.msra.gmra.mxu1 %v1888_v8  ;;  %v848_v8 = vadd.f32 %v1820_v61, %v1699_v1 }
 0x107   : > { %1834 = vmatprep.mubr.bf16.mxu1 %v1889_v7 }
 0x10e   : > { %1835 = vmatmul.mubr.bf16.gmra.mxu1 %v1890_v9 }
 0x1c6   : > { %v1832_v21 = vpop.f32.mrf.mxu1 }
 0x1c7   : > { %v2165_v22 = vmul.f32 0.17677669, %v1832_v21  ;;  %v2263_v21 = vld [vmem:[#allocation3 + $0x28] sm:$0xff] }
 0x1c8   : > { %v924_v23 = vpop.f32.mrf.mxu1 }
 0x1c9   : > { %v2167_v27 = vmul.f32 0.17677669, %v924_v23  ;;  %v978_v28 = vsel %vm971_vm2, %v2165_v22, -inf  ;;  %v832_v23 = vadd.f32 %v1816_v47, %v1699_v1 }
 0x1ca   : > { %979 = vmax.xlane.f32.xlu1 %v978_v28  ;;  %v1833_v29 = vpop.f32.mrf.mxu1  ;;  %v835_v28 = vadd.f32 %v1817_v52, %v1699_v1 }
 0x1cb   : > { %v2171_v30 = vmul.f32 0.17677669, %v1833_v29  ;;  %v972_v11 = vsel %vm971_vm2, %v2167_v27, -inf  ;;  %v1212_v29 = vpack.c.bf16 %v851_v10, %v848_v8 }
 0x1cc   : > { %973 = vmax.xlane.f32.xlu0 %v972_v11  ;;  %v927_v12 = vpop.f32.mrf.mxu1  ;;  %v842_v11 = vpop.f32.mrf.mxu0 }
 0x1cd   : > { %v2175_v24 = vmul.f32 0.17677669, %v927_v12  ;;  %v981_v31 = vsel %vm971_vm2, %v2171_v30, -inf  ;;  %1838 = vmatprep.subr.bf16.mxu0 %v1212_v29 }
 0x1ce   : > { %982 = vmax.xlane.f32.xlu1 %v981_v31  ;;  %v1836_v32 = vpop.f32.mrf.mxu1  ;;  %v840_v31 = vadd.f32 %v1699_v1, %v839_v2  ;;  %1839 = vmatpush3.bf16.msra.mxu0 %v1212_v29 }
 0x1cf   : > { %v975_v33 = vsel %vm971_vm2, %v2175_v24, -inf  ;;  %v2183_v37 = vmul.f32 0.17677669, %v1836_v32  ;;  %v843_v32 = vadd.f32 %v1699_v1, %v842_v11 }
 0x1d0   : > { %976 = vmax.xlane.f32.xlu0 %v975_v33  ;;  %v940_v34 = vpop.f32.mrf.mxu1 }
 0x1d1   : > { %v2181_v35 = vmul.f32 0.17677669, %v940_v34  ;;  %v990_v43 = vsel %vm971_vm2, %v2183_v37, -inf }
 0x1d2   : > { %v1837_v36 = vpop.f32.mrf.mxu1 }
 0x1d3   : > { %v984_v38 = vsel %vm971_vm2, %v2181_v35, -inf  ;;  %v2189_v42 = vmul.f32 0.17677669, %v1837_v36 }
 0x1d4   : > { %985 = vmax.xlane.f32.xlu0 %v984_v38  ;;  %v943_v39 = vpop.f32.mrf.mxu1 }
 0x1d5   : > { %v2187_v40 = vmul.f32 0.17677669, %v943_v39  ;;  %v993_v45 = vsel %vm971_vm2, %v2189_v42, -inf  ;;  %v1211_v39 = vpack.c.bf16 %v843_v32, %v840_v31 }
 0x1d7   : > { %v987_v44 = vsel %vm971_vm2, %v2187_v40, -inf  ;;  %1840 = vmatprep.subr.bf16.mxu0 %v1211_v39 }
 0x1d8   : > { %991 = vmax.xlane.f32.xlu0 %v990_v43  ;;  %988 = vmax.xlane.f32.xlu1 %v987_v44  ;;  %v824_v43 = vadd.f32 %v1699_v1, %v823_v48  ;;  %v1210_v44 = vpack.c.bf16 %v835_v28, %v832_v23 }
 0x1d9   : > { %1841 = vmatpush3.bf16.msra.mxu0 %v1211_v39 }
 0x1da   : > { %1842 = vmatprep.subr.bf16.mxu0 %v1210_v44 }
 0x1dc   : > { %994 = vmax.xlane.f32.xlu1 %v993_v45  ;;  %v827_v45 = vadd.f32 %v1699_v1, %v826_v56 }
 0x1dd   : > { %1843 = vmatpush3.bf16.msra.mxu0 %v1210_v44 }
 0x1de   : > { %v1209_v52 = vpack.c.bf16 %v827_v45, %v824_v43 }
 0x1e0   : > { %1844 = vmatprep.subr.bf16.mxu0 %v1209_v52 }
 0x1e1   : > { %1845 = vmatpush3.bf16.msra.mxu0 %v1209_v52 }
 0x253   : > { %v980_v50 = vpop.xlane.xlu1 %979 }
 0x254   : > { %v2218_v53 = vmax.f32 %v2213_v49, %v980_v50 }
 0x255   : > { %v974_v54 = vpop.xlane.xlu0 %973 }
 0x256   : > { %v1006_v57 = vsub.f32 %v2213_v49, %v2218_v53  ;;  %1308 = vst.msk [vmem:[#allocation3 + $0x10] sm:$0xff] %vm628_vm1, %v2218_v53  ;;  %v2227_v58 = vmax.f32 %v2215_v51, %v974_v54  ;;  %1040 = vperm.xlu1 %1882, %v2218_v53  }
 0x257   : > { %v983_v59 = vpop.xlane.xlu1 %982 }
 0x258   : > { %v1004_v62 = vsub.f32 %v2215_v51, %v2227_v58  ;;  %1306 = vst.msk [vmem:[#allocation3] sm:$0xff] %vm628_vm1, %v2227_v58  ;;  %v2237_v63 = vmax.f32 %v2220_v55, %v983_v59  ;;  %1030 = vperm.xlu0 %1881, %v2227_v58  }
 0x259   : > { %v977_v0 = vpop.xlane.xlu0 %976 }
 0x25a   : > { %v1007_v3 = vsub.f32 %v2220_v55, %v2237_v63  ;;  %1309 = vst.msk [vmem:[#allocation3 + $0x18] sm:$0xff] %vm628_vm1, %v2237_v63  ;;  %v2248_v4 = vmax.f32 %v2230_v60, %v977_v0  ;;  %1045 = vperm.xlu1 %1882, %v2237_v63  }
 0x25c   : > { %v1005_v7 = vsub.f32 %v2230_v60, %v2248_v4  ;;  %1307 = vst.msk [vmem:[#allocation3 + $0x8] sm:$0xff] %vm628_vm1, %v2248_v4  ;;  %v1018_v60 = vmul.f32 1.442695, %v1007_v3 }
 0x25d   : > { %v986_v9 = vpop.xlane.xlu0 %985 }
 0x25e   : > { %v2258_v17 = vmax.f32 %v2251_v5, %v986_v9  ;;  %1035 = vperm.xlu1 %1882, %v2248_v4  }
 0x260   : > { %v1008_v12 = vsub.f32 %v2251_v5, %v2258_v17  ;;  %1310 = vst.msk [vmem:[#allocation3 + $0x20] sm:$0xff] %vm628_vm1, %v2258_v17 }
 0x261   : > { %v992_v33 = vpop.xlane.xlu0 %991  ;;  %v989_v34 = vpop.xlane.xlu1 %988 }
 0x262   : > { %v2270_v36 = vmax.f32 %v2261_v18, %v992_v33  ;;  %v2273_v38 = vmax.f32 %v2263_v21, %v989_v34  ;;  %v1020_v4 = vmul.f32 1.442695, %v1008_v12 }
 0x264   : > { %v1010_v46 = vsub.f32 %v2261_v18, %v2270_v36  ;;  %1312 = vst.msk [vmem:[#allocation3 + $0x30] sm:$0xff] %vm628_vm1, %v2270_v36  ;;  %v1009_v47 = vsub.f32 %v2263_v21, %v2273_v38  ;;  %1311 = vst.msk [vmem:[#allocation3 + $0x28] sm:$0xff] %vm628_vm1, %v2273_v38  ;;  %1060 = vperm.xlu1 %1882, %v2270_v36   ;;  %v1092_v18 = vld [vmem:[#allocation4] sm:$0xff] }
 0x265   : > { %v995_v50 = vpop.xlane.xlu1 %994 }
 0x266   : > { %v2287_v48 = vmax.f32 %v2275_v41, %v995_v50  ;;  %v1022_v51 = vmul.f32 1.442695, %v1009_v47  ;;  %v1024_v49 = vmul.f32 1.442695, %v1010_v46  ;;  %v1095_v46 = vld [vmem:[#allocation4 + $0x18] sm:$0xff] }
 0x268   : > { %v1011_v54 = vsub.f32 %v2275_v41, %v2287_v48  ;;  %1313 = vst.msk [vmem:[#allocation3 + $0x38] sm:$0xff] %vm628_vm1, %v2287_v48  ;;  %1050 = vperm.xlu1 %1882, %v2258_v17   ;;  %v1094_v17 = vld [vmem:[#allocation4 + $0x10] sm:$0xff] }
 0x26a   : > { %v1026_v53 = vmul.f32 1.442695, %v1011_v54 }
 0x26c   : > { %1055 = vperm.xlu1 %1882, %v2273_v38  }
 0x270   : > { %1065 = vperm.xlu1 %1882, %v2287_v48   ;;  %v1093_v48 = vld [vmem:[#allocation4 + $0x8] sm:$0xff] }
 0x2d1   : > { %v1041_v56 = vpop.permute.xlu1 %1040 }
 0x2d2   : > { %v1070_v59 = vsub.f32 %v2165_v22, %v1041_v56 }
 0x2d3   : > { %v1031_v61 = vpop.permute.xlu0 %1030 }
 0x2d4   : > { %v1080_v0 = vmul.f32 1.442695, %v1070_v59  ;;  %v1068_v1 = vsub.f32 %v2167_v27, %v1031_v61 }
 0x2d5   : > { %v1046_v2 = vpop.permute.xlu1 %1045 }
 0x2d6   : > { %1893 = vpow2.f32 %v1080_v0  ;;  %v1076_v6 = vmul.f32 1.442695, %v1068_v1  ;;  %v1071_v8 = vsub.f32 %v2171_v30, %v1046_v2 }
 0x2d8   : > { %1895 = vpow2.f32 %v1076_v6  ;;  %v1082_v9 = vmul.f32 1.442695, %v1071_v8 }
 0x2d9   : > { %v1036_v10 = vpop.permute.xlu1 %1035 }
 0x2da   : > { %1897 = vpow2.f32 %v1082_v9  ;;  %v1069_v23 = vsub.f32 %v2175_v24, %v1036_v10 }
 0x2dc   : > { %v1078_v28 = vmul.f32 1.442695, %v1069_v23  ;;  %v1014_v23 = vmul.f32 1.442695, %v1005_v7 }
 0x2de   : > { %1899 = vpow2.f32 %v1078_v28 }
 0x2df   : > { %v1061_v29 = vpop.permute.xlu1 %1060 }
 0x2e0   : > { %v1074_v22 = vsub.f32 %v2183_v37, %v1061_v29 }
 0x2e2   : > { %v1088_v30 = vmul.f32 1.442695, %v1074_v22  ;;  %v1012_v22 = vmul.f32 1.442695, %v1004_v62 }
 0x2e3   : > { %v1894_v11 = vpop.eup %1893  ;;  %v1051_v31 = vpop.permute.xlu1 %1050 }
 0x2e4   : > { %v1072_v27 = vsub.f32 %v2181_v35, %v1051_v31  ;;  %v1114_v32 = vsel %vm971_vm2, %v1894_v11, 0.0 }
 0x2e5   : > { %v1896_v33 = vpop.eup %1895  ;;  %1115 = vadd.xlane.f32.xlu0 %v1114_v32 }
 0x2e6   : > { %v1084_v34 = vmul.f32 1.442695, %v1072_v27  ;;  %v1108_v39 = vsel %vm971_vm2, %v1896_v33, 0.0 }
 0x2e7   : > { %v1898_v43 = vpop.eup %1897  ;;  %1109 = vadd.xlane.f32.xlu1 %v1108_v39  ;;  %v1056_v24 = vpop.permute.xlu1 %1055 }
 0x2e8   : > { %1901 = vpow2.f32 %v1084_v34  ;;  %v1073_v44 = vsub.f32 %v2187_v40, %v1056_v24  ;;  %v1117_v45 = vsel %vm971_vm2, %v1898_v43, 0.0  ;;  %v1206_v61 = vpack.c.bf16 %v1898_v43, %v1894_v11  ;;  %v1096_v43 = vld [vmem:[#allocation4 + $0x20] sm:$0xff] }
 0x2e9   : > { %1903 = vpow2.f32 %v1088_v30  ;;  %v1016_v11 = vmul.f32 1.442695, %v1006_v57 }
 0x2ea   : > { %v1086_v37 = vmul.f32 1.442695, %v1073_v44 }
 0x2eb   : > { %v1900_v50 = vpop.eup %1899  ;;  %1118 = vadd.xlane.f32.xlu1 %v1117_v45  ;;  %v1066_v35 = vpop.permute.xlu1 %1065  ;;  %v1098_v45 = vld [vmem:[#allocation4 + $0x30] sm:$0xff] }
 0x2ec   : > { %1905 = vpow2.f32 %v1086_v37  ;;  %v1075_v52 = vsub.f32 %v2189_v42, %v1066_v35  ;;  %v1111_v56 = vsel %vm971_vm2, %v1900_v50, 0.0  ;;  %v1205_v59 = vpack.c.bf16 %v1900_v50, %v1896_v33  ;;  %v1097_v50 = vld [vmem:[#allocation4 + $0x28] sm:$0xff] }
 0x2ed   : > { %1112 = vadd.xlane.f32.xlu0 %v1111_v56 }
 0x2ee   : > { %v1090_v0 = vmul.f32 1.442695, %v1075_v52  ;;  %1846 = vmatprep.mubr.msk.bf16.mxu0 %vm971_vm2, %v1205_v59 }
 0x2ef   : > { %1847 = vmatmul.mubr.msk.bf16.vlgmr.msra.gmra.mxu0 %vm971_vm2, %v1206_v61 }
 0x2f0   : > { %1907 = vpow2.f32 %v1090_v0 }
 0x2f1   : > { %1909 = vpow2.f32 %v1014_v23 }
 0x2f2   : > { %1911 = vpow2.f32 %v1012_v22 }
 0x2f3   : > { %1913 = vpow2.f32 %v1016_v11 }
 0x2f4   : > { %1915 = vpow2.f32 %v1018_v60 }
 0x2f5   : > { %v1902_v40 = vpop.eup %1901  ;;  %1917 = vpow2.f32 %v1020_v4 }
 0x2f6   : > { %v1120_v1 = vsel %vm971_vm2, %v1902_v40, 0.0  ;;  %v1904_v2 = vpop.eup %1903  ;;  %1919 = vpow2.f32 %v1022_v51 }
 0x2f7   : > { %1121 = vadd.xlane.f32.xlu0 %v1120_v1  ;;  %v1126_v8 = vsel %vm971_vm2, %v1904_v2, 0.0  ;;  %1921 = vpow2.f32 %v1024_v49 }
 0x2f8   : > { %1923 = vpow2.f32 %v1026_v53 }
 0x2f9   : > { %v1906_v6 = vpop.eup %1905 }
 0x2fa   : > { %v1123_v42 = vsel %vm971_vm2, %v1906_v6, 0.0  ;;  %v1207_v9 = vpack.c.bf16 %v1906_v6, %v1902_v40  ;;  %v1099_v40 = vld [vmem:[#allocation4 + $0x38] sm:$0xff] }
 0x2fb   : > { %1127 = vadd.xlane.f32.xlu0 %v1126_v8  ;;  %1124 = vadd.xlane.f32.xlu1 %v1123_v42 }
 0x2fc   : > { %1850 = vmatprep.mubr.msk.bf16.mxu0 %vm971_vm2, %v1207_v9 }
 0x2fd   : > { %v1908_v10 = vpop.eup %1907 }
 0x2fe   : > { %v1129_v28 = vsel %vm971_vm2, %v1908_v10, 0.0  ;;  %v1208_v29 = vpack.c.bf16 %v1908_v10, %v1904_v2  ;;  %v1910_v55 = vpop.eup %1909 }
 0x2ff   : > { %1130 = vadd.xlane.f32.xlu1 %v1129_v28  ;;  %v1912_v57 = vpop.eup %1911  ;;  %v1101_v32 = vmul.f32 %v1910_v55, %v1093_v48 }
 0x300   : > { %1851 = vmatmul.mubr.msk.bf16.gmra.mxu0 %vm971_vm2, %v1208_v29  ;;  %v1914_v58 = vpop.eup %1913  ;;  %v1100_v38 = vmul.f32 %v1912_v57, %v1092_v18 }
 0x301   : > { %v1916_v62 = vpop.eup %1915  ;;  %v1102_v21 = vmul.f32 %v1914_v58, %v1094_v17 }
 0x302   : > { %v1918_v63 = vpop.eup %1917  ;;  %v1103_v54 = vmul.f32 %v1916_v62, %v1095_v46 }
 0x303   : > { %v1920_v3 = vpop.eup %1919  ;;  %v1104_v44 = vmul.f32 %v1918_v63, %v1096_v43  ;;  %v1156_v43 = vld [vmem:[#allocation5 + $0x38] sm:$0xff] }
 0x304   : > { %v1922_v5 = vpop.eup %1921  ;;  %v1105_v59 = vmul.f32 %v1920_v3, %v1097_v50  ;;  %v1154_v50 = vld [vmem:[#allocation5 + $0x28] sm:$0xff] }
 0x305   : > { %v1924_v7 = vpop.eup %1923  ;;  %v1106_v56 = vmul.f32 %v1922_v5, %v1098_v45 }
 0x306   : > { %v1107_v8 = vmul.f32 %v1924_v7, %v1099_v40 }
 0x310   : > { %1164 = vperm.xlu1 %1882, %v1910_v55  }
 0x311   : > { %1159 = vperm.xlu0 %1881, %v1912_v57  }
 0x314   : > { %1169 = vperm.xlu1 %1882, %v1914_v58   ;;  %v1151_v58 = vld [vmem:[#allocation5 + $0x10] sm:$0xff] }
 0x315   : > { %1174 = vperm.xlu0 %1881, %v1916_v62  }
 0x318   : > { %1179 = vperm.xlu1 %1882, %v1918_v63   ;;  %v1149_v63 = vld [vmem:[#allocation5] sm:$0xff] }
 0x319   : > { %1184 = vperm.xlu0 %1881, %v1920_v3  }
 0x31c   : > { %1189 = vperm.xlu1 %1882, %v1922_v5   ;;  %v1152_v5 = vld [vmem:[#allocation5 + $0x18] sm:$0xff] }
 0x31d   : > { %1194 = vperm.xlu0 %1881, %v1924_v7  }
 0x36e   : > { %v1116_v12 = vpop.xlane.xlu0 %1115 }
 0x36f   : > { %v1134_v36 = vadd.f32 %v1116_v12, %v1102_v21  ;;  %v1150_v12 = vld [vmem:[#allocation5 + $0x8] sm:$0xff] }
 0x370   : > { %v1110_v41 = vpop.xlane.xlu1 %1109 }
 0x371   : > { %1143 = vst.msk [vmem:[#allocation4 + $0x10] sm:$0xff] %vm628_vm1, %v1134_v36  ;;  %v1132_v47 = vadd.f32 %v1110_v41, %v1100_v38 }
 0x373   : > { %1141 = vst.msk [vmem:[#allocation4] sm:$0xff] %vm628_vm1, %v1132_v47 }
 0x374   : > { %v1119_v31 = vpop.xlane.xlu1 %1118 }
 0x375   : > { %v1135_v27 = vadd.f32 %v1119_v31, %v1103_v54 }
 0x376   : > { %v1113_v33 = vpop.xlane.xlu0 %1112 }
 0x377   : > { %1144 = vst.msk [vmem:[#allocation4 + $0x18] sm:$0xff] %vm628_vm1, %v1135_v27  ;;  %v1133_v30 = vadd.f32 %v1113_v33, %v1101_v32  ;;  %v1155_v33 = vld [vmem:[#allocation5 + $0x30] sm:$0xff] }
 0x378   : > { %v1327_v34 = vld [vmem:[#allocation4 + $0x10] sm:$0xff] }
 0x379   : > { %1142 = vst.msk [vmem:[#allocation4 + $0x8] sm:$0xff] %vm628_vm1, %v1133_v30  ;;  %1925 = vrcp.f32 %v1327_v34  ;;  %v1153_v34 = vld [vmem:[#allocation5 + $0x20] sm:$0xff] }
 0x37a   : > { %v1325_v39 = vld [vmem:[#allocation4] sm:$0xff] }
 0x37b   : > { %1927 = vrcp.f32 %v1325_v39 }
 0x37e   : > { %v1328_v24 = vld [vmem:[#allocation4 + $0x18] sm:$0xff] }
 0x37f   : > { %1929 = vrcp.f32 %v1328_v24 }
 0x380   : > { %v1122_v37 = vpop.xlane.xlu0 %1121  ;;  %v1326_v35 = vld [vmem:[#allocation4 + $0x8] sm:$0xff] }
 0x381   : > { %v1136_v52 = vadd.f32 %v1122_v37, %v1104_v44  ;;  %1931 = vrcp.f32 %v1326_v35 }
 0x383   : > { %1145 = vst.msk [vmem:[#allocation4 + $0x20] sm:$0xff] %vm628_vm1, %v1136_v52 }
 0x384   : > { %v1128_v61 = vpop.xlane.xlu0 %1127  ;;  %v1125_v0 = vpop.xlane.xlu1 %1124 }
 0x385   : > { %v1138_v1 = vadd.f32 %v1128_v61, %v1106_v56  ;;  %v1137_v2 = vadd.f32 %v1125_v0, %v1105_v59 }
 0x386   : > { %v1926_v6 = vpop.eup %1925 }
 0x387   : > { %1147 = vst.msk [vmem:[#allocation4 + $0x30] sm:$0xff] %vm628_vm1, %v1138_v1  ;;  %1146 = vst.msk [vmem:[#allocation4 + $0x28] sm:$0xff] %vm628_vm1, %v1137_v2  ;;  %1353 = vperm.xlu1 %1882, %v1926_v6   ;;  %v1398_v6 = vstv %s1397_s12 }
 0x388   : > { %v1131_v42 = vpop.xlane.xlu1 %1130  ;;  %v1928_v10 = vpop.eup %1927 }
 0x389   : > { %v1139_v9 = vadd.f32 %v1131_v42, %v1107_v8 }
 0x38a   : > { %v1329_v23 = vld [vmem:[#allocation4 + $0x20] sm:$0xff] }
 0x38b   : > { %1148 = vst.msk [vmem:[#allocation4 + $0x38] sm:$0xff] %vm628_vm1, %v1139_v9  ;;  %1343 = vperm.xlu1 %1882, %v1928_v10   ;;  %1933 = vrcp.f32 %v1329_v23 }
 0x38c   : > { %v1930_v28 = vpop.eup %1929  ;;  %v1165_v55 = vpop.permute.xlu1 %1164 }
 0x38d   : > { %1358 = vperm.xlu0 %1881, %v1930_v28   ;;  %v1160_v57 = vpop.permute.xlu0 %1159  ;;  %v1198_v47 = vmul.f32 %v1165_v55, %v1150_v12 }
 0x38e   : > { %v1331_v29 = vld [vmem:[#allocation4 + $0x30] sm:$0xff]  ;;  %v1330_v22 = vld [vmem:[#allocation4 + $0x28] sm:$0xff]  ;;  %v1932_v11 = vpop.eup %1931  ;;  %v1197_v18 = vmul.f32 %v1160_v57, %v1149_v63 }
 0x38f   : > { %1935 = vrcp.f32 %v1331_v29 }
 0x390   : > { %1937 = vrcp.f32 %v1330_v22  ;;  %v1170_v62 = vpop.permute.xlu1 %1169 }
 0x391   : > { %1348 = vperm.xlu0 %1881, %v1932_v11   ;;  %v1199_v3 = vmul.f32 %v1170_v62, %v1151_v58  ;;  %v1175_v7 = vpop.permute.xlu0 %1174 }
 0x392   : > { %v1332_v60 = vld [vmem:[#allocation4 + $0x38] sm:$0xff]  ;;  %v1200_v38 = vmul.f32 %v1175_v7, %v1152_v5 }
 0x393   : > { %1939 = vrcp.f32 %v1332_v60 }
 0x394   : > { %v1180_v31 = vpop.permute.xlu1 %1179 }
 0x395   : > { %v1185_v32 = vpop.permute.xlu0 %1184  ;;  %v1201_v37 = vmul.f32 %v1180_v31, %v1153_v34 }
 0x396   : > { %v1202_v61 = vmul.f32 %v1185_v32, %v1154_v50 }
 0x398   : > { %v1934_v4 = vpop.eup %1933  ;;  %v1190_v30 = vpop.permute.xlu1 %1189 }
 0x399   : > { %1363 = vperm.xlu1 %1882, %v1934_v4   ;;  %v1203_v39 = vmul.f32 %v1190_v30, %v1155_v33  ;;  %v1195_v24 = vpop.permute.xlu0 %1194 }
 0x39a   : > { %v1204_v52 = vmul.f32 %v1195_v24, %v1156_v43 }
 0x39c   : > { %v1936_v51 = vpop.eup %1935 }
 0x39d   : > { %v1938_v49 = vpop.eup %1937  ;;  %1373 = vperm.xlu1 %1882, %v1936_v51  }
 0x39e   : > { %1368 = vperm.xlu0 %1881, %v1938_v49  }
 0x3a0   : > { %v1940_v53 = vpop.eup %1939 }
 0x3a2   : > { %1378 = vperm.xlu0 %1881, %v1940_v53  }
 0x3af   : > { %v1848_v17 = vpop.f32.mrf.mxu0 }
 0x3b0   : > { %v1292_v21 = vadd.f32 %v1848_v17, %v1199_v3 }
 0x3b1   : > { %v1259_v36 = vpop.f32.mrf.mxu0 }
 0x3b2   : > { %1300 = vst.msk [vmem:[#allocation5 + $0x10] sm:$0xff] %vm510_vm0, %v1292_v21  ;;  %v1290_v41 = vadd.f32 %v1259_v36, %v1197_v18 }
 0x3b3   : > { %v1849_v46 = vpop.f32.mrf.mxu0 }
 0x3b4   : > { %1298 = vst.msk [vmem:[#allocation5] sm:$0xff] %vm510_vm0, %v1290_v41  ;;  %v1293_v48 = vadd.f32 %v1849_v46, %v1200_v38 }
 0x3b5   : > { %v1262_v54 = vpop.f32.mrf.mxu0 }
 0x3b6   : > { %1301 = vst.msk [vmem:[#allocation5 + $0x18] sm:$0xff] %vm510_vm0, %v1293_v48  ;;  %v1291_v27 = vadd.f32 %v1262_v54, %v1198_v47 }
 0x3b8   : > { %1299 = vst.msk [vmem:[#allocation5 + $0x8] sm:$0xff] %vm510_vm0, %v1291_v27 }
 0x3b9   : > { %v1319_v2 = vld [vmem:[#allocation5 + $0x10] sm:$0xff] }
 0x3bb   : > { %v1317_v10 = vld [vmem:[#allocation5] sm:$0xff] }
 0x3bd   : > { %v1320_v22 = vld [vmem:[#allocation5 + $0x18] sm:$0xff] }
 0x3bf   : > { %v1318_v57 = vld [vmem:[#allocation5 + $0x8] sm:$0xff] }
 0x3c0   : > { %v1852_v44 = vpop.f32.mrf.mxu0 }
 0x3c1   : > { %v1296_v45 = vadd.f32 %v1852_v44, %v1203_v39 }
 0x3c2   : > { %v1275_v35 = vpop.f32.mrf.mxu0 }
 0x3c3   : > { %1304 = vst.msk [vmem:[#allocation5 + $0x30] sm:$0xff] %vm510_vm0, %v1296_v45  ;;  %v1294_v56 = vadd.f32 %v1275_v35, %v1201_v37 }
 0x3c4   : > { %v1853_v59 = vpop.f32.mrf.mxu0 }
 0x3c5   : > { %1302 = vst.msk [vmem:[#allocation5 + $0x20] sm:$0xff] %vm510_vm0, %v1294_v56  ;;  %v1297_v0 = vadd.f32 %v1853_v59, %v1204_v52 }
 0x3c6   : > { %v1278_v40 = vpop.f32.mrf.mxu0 }
 0x3c7   : > { %1305 = vst.msk [vmem:[#allocation5 + $0x38] sm:$0xff] %vm510_vm0, %v1297_v0  ;;  %v1295_v1 = vadd.f32 %v1278_v40, %v1202_v61 }
 0x3c9   : > { %1303 = vst.msk [vmem:[#allocation5 + $0x28] sm:$0xff] %vm510_vm0, %v1295_v1 }
 0x3ca   : > { %v1323_v12 = vld [vmem:[#allocation5 + $0x30] sm:$0xff] }
 0x3cc   : > { %v1321_v17 = vld [vmem:[#allocation5 + $0x20] sm:$0xff] }
 0x3ce   : > { %v1324_v31 = vld [vmem:[#allocation5 + $0x38] sm:$0xff] }
 0x3d0   : > { %v1322_v38 = vld [vmem:[#allocation5 + $0x28] sm:$0xff] }
 0x402   : > { %v1354_v8 = vpop.permute.xlu1 %1353 }
 0x403   : > { %v1383_v42 = vmul.f32 %v1354_v8, %v1319_v2 }
 0x405   : > { %v1401_v9 = vmul.f32 %v1398_v6, %v1383_v42 }
 0x406   : > { %v1344_v23 = vpop.permute.xlu1 %1343 }
 0x407   : > { %v1381_v28 = vmul.f32 %v1344_v23, %v1317_v10  ;;  %v1409_v29 = vadd.f32 %v1401_v9, %v2101_v15 }
 0x408   : > { %v1359_v11 = vpop.permute.xlu0 %1358 }
 0x409   : > { %v1399_v60 = vmul.f32 %v1398_v6, %v1381_v28  ;;  %v1384_v4 = vmul.f32 %v1359_v11, %v1320_v22  ;;  %v1421_v51 = vsel %vm510_vm0, %v1409_v29, 0.0 }
 0x40a   : > { %1422 = vadd.xlane.f32.xlu0 %v1421_v51 }
 0x40b   : > { %v1402_v49 = vmul.f32 %v1398_v6, %v1384_v4  ;;  %v1407_v53 = vadd.f32 %v1399_v60, %v2094_v13 }
 0x40c   : > { %v1349_v55 = vpop.permute.xlu0 %1348 }
 0x40d   : > { %v1382_v58 = vmul.f32 %v1349_v55, %v1318_v57  ;;  %v1415_v62 = vsel %vm510_vm0, %v1407_v53, 0.0  ;;  %v1410_v63 = vadd.f32 %v1402_v49, %v2104_v16 }
 0x40e   : > { %1416 = vadd.xlane.f32.xlu1 %v1415_v62 }
 0x40f   : > { %v1400_v3 = vmul.f32 %v1398_v6, %v1382_v58  ;;  %v1424_v15 = vsel %vm510_vm0, %v1410_v63, 0.0 }
 0x411   : > { %v1408_v5 = vadd.f32 %v1400_v3, %v2098_v14 }
 0x412   : > { %1425 = vadd.xlane.f32.xlu1 %v1424_v15 }
 0x413   : > { %v1418_v7 = vsel %vm510_vm0, %v1408_v5, 0.0 }
 0x414   : > { %1419 = vadd.xlane.f32.xlu0 %v1418_v7  ;;  %v1364_v18 = vpop.permute.xlu1 %1363 }
 0x415   : > { %v1385_v13 = vmul.f32 %v1364_v18, %v1321_v17 }
 0x417   : > { %v1403_v21 = vmul.f32 %v1398_v6, %v1385_v13 }
 0x418   : > { %v1374_v36 = vpop.permute.xlu1 %1373 }
 0x419   : > { %v1369_v41 = vpop.permute.xlu0 %1368  ;;  %v1387_v46 = vmul.f32 %v1374_v36, %v1323_v12  ;;  %v1411_v16 = vadd.f32 %v1403_v21, %v2113_v19 }
 0x41a   : > { %v1386_v47 = vmul.f32 %v1369_v41, %v1322_v38 }
 0x41b   : > { %v1405_v48 = vmul.f32 %v1398_v6, %v1387_v46  ;;  %v1427_v54 = vsel %vm510_vm0, %v1411_v16, 0.0 }
 0x41c   : > { %v1404_v14 = vmul.f32 %v1398_v6, %v1386_v47  ;;  %1428 = vadd.xlane.f32.xlu0 %v1427_v54 }
 0x41d   : > { %v1379_v27 = vpop.permute.xlu0 %1378  ;;  %v1413_v32 = vadd.f32 %v1405_v48, %v2128_v25 }
 0x41e   : > { %v1388_v33 = vmul.f32 %v1379_v27, %v1324_v31  ;;  %v1412_v30 = vadd.f32 %v1404_v14, %v2116_v20  ;;  %v1714_v14 = vld [vmem:[%s2466_s9] ss:$0 sm:$0xff] }
 0x41f   : > { %v1433_v34 = vsel %vm510_vm0, %v1413_v32, 0.0 }
 0x420   : > { %v1406_v39 = vmul.f32 %v1398_v6, %v1388_v33  ;;  %v1430_v43 = vsel %vm510_vm0, %v1412_v30, 0.0  ;;  %1434 = vadd.xlane.f32.xlu0 %v1433_v34  ;;  %v1715_v33 = vld [vmem:[%s2467_s10] ss:$0 sm:$0xff] }
 0x421   : > { %1431 = vadd.xlane.f32.xlu1 %v1430_v43 }
 0x422   : > { %v1414_v19 = vadd.f32 %v1406_v39, %v2131_v26 }
 0x424   : > { %v1436_v24 = vsel %vm510_vm0, %v1414_v19, 0.0 }
 0x425   : > { %1437 = vadd.xlane.f32.xlu1 %v1436_v24 }
 0x493   : > { %v1423_v44 = vpop.xlane.xlu0 %1422 }
 0x494   : > { %v1442_v37 = vmul.f32 0.03125, %v1423_v44 }
 0x496   : > { %v2372_v45 = vsub.f32 %v1409_v29, %v1442_v37 }
 0x497   : > { %v1417_v25 = vpop.xlane.xlu1 %1416 }
 0x498   : > { %v1440_v50 = vmul.f32 0.03125, %v1417_v25  ;;  %v1458_v20 = vmul.f32 %v2372_v45, %v2372_v45 }
 0x49a   : > { %v2376_v35 = vsub.f32 %v1407_v53, %v1440_v50  ;;  %v1470_v52 = vsel %vm510_vm0, %v1458_v20, 0.0 }
 0x49b   : > { %1471 = vadd.xlane.f32.xlu0 %v1470_v52  ;;  %v1426_v56 = vpop.xlane.xlu1 %1425 }
 0x49c   : > { %v1443_v59 = vmul.f32 0.03125, %v1426_v56  ;;  %v1456_v26 = vmul.f32 %v2376_v35, %v2376_v35 }
 0x49d   : > { %v1420_v61 = vpop.xlane.xlu0 %1419 }
 0x49e   : > { %v2381_v0 = vsub.f32 %v1410_v63, %v1443_v59  ;;  %v1441_v40 = vmul.f32 0.03125, %v1420_v61  ;;  %v1464_v1 = vsel %vm510_vm0, %v1456_v26, 0.0 }
 0x49f   : > { %1465 = vadd.xlane.f32.xlu0 %v1464_v1 }
 0x4a0   : > { %v2384_v2 = vsub.f32 %v1408_v5, %v1441_v40  ;;  %v1459_v6 = vmul.f32 %v2381_v0, %v2381_v0 }
 0x4a2   : > { %v1473_v8 = vsel %vm510_vm0, %v1459_v6, 0.0  ;;  %v1457_v42 = vmul.f32 %v2384_v2, %v2384_v2 }
 0x4a3   : > { %1474 = vadd.xlane.f32.xlu1 %v1473_v8 }
 0x4a4   : > { %v1467_v23 = vsel %vm510_vm0, %v1457_v42, 0.0 }
 0x4a5   : > { %v1429_v9 = vpop.xlane.xlu0 %1428 }
 0x4a6   : > { %v1444_v10 = vmul.f32 0.03125, %v1429_v9 }
 0x4a7   : > { %1468 = vadd.xlane.f32.xlu1 %v1467_v23 }
 0x4a8   : > { %v2392_v28 = vsub.f32 %v1411_v16, %v1444_v10 }
 0x4a9   : > { %v1435_v29 = vpop.xlane.xlu0 %1434 }
 0x4aa   : > { %v1446_v22 = vmul.f32 0.03125, %v1435_v29  ;;  %v1432_v11 = vpop.xlane.xlu1 %1431  ;;  %v1460_v60 = vmul.f32 %v2392_v28, %v2392_v28 }
 0x4ab   : > { %v1445_v4 = vmul.f32 0.03125, %v1432_v11 }
 0x4ac   : > { %v2396_v51 = vsub.f32 %v1413_v32, %v1446_v22  ;;  %v1476_v49 = vsel %vm510_vm0, %v1460_v60, 0.0 }
 0x4ad   : > { %v2399_v53 = vsub.f32 %v1412_v30, %v1445_v4  ;;  %1477 = vadd.xlane.f32.xlu0 %v1476_v49 }
 0x4ae   : > { %v1438_v55 = vpop.xlane.xlu1 %1437  ;;  %v1462_v57 = vmul.f32 %v2396_v51, %v2396_v51 }
 0x4af   : > { %v1447_v58 = vmul.f32 0.03125, %v1438_v55  ;;  %v1461_v62 = vmul.f32 %v2399_v53, %v2399_v53 }
 0x4b0   : > { %v1482_v63 = vsel %vm510_vm0, %v1462_v57, 0.0 }
 0x4b1   : > { %v2406_v3 = vsub.f32 %v1414_v19, %v1447_v58  ;;  %1483 = vadd.xlane.f32.xlu0 %v1482_v63  ;;  %v1479_v15 = vsel %vm510_vm0, %v1461_v62, 0.0 }
 0x4b2   : > { %1480 = vadd.xlane.f32.xlu1 %v1479_v15 }
 0x4b3   : > { %v1463_v5 = vmul.f32 %v2406_v3, %v2406_v3 }
 0x4b5   : > { %v1485_v7 = vsel %vm510_vm0, %v1463_v5, 0.0 }
 0x4b6   : > { %1486 = vadd.xlane.f32.xlu1 %v1485_v7 }
 0x524   : > { %v1472_v17 = vpop.xlane.xlu0 %1471 }
 0x525   : > { %v1490_v18 = vmul.f32 0.03125, %v1472_v17 }
 0x527   : > { %v1498_v13 = vadd.f32 1e-05, %v1490_v18 }
 0x528   : > { %v1466_v21 = vpop.xlane.xlu0 %1465 }
 0x529   : > { %1941 = vrsqrt.f32 %v1498_v13  ;;  %v1488_v12 = vmul.f32 0.03125, %v1466_v21 }
 0x52b   : > { %v1496_v36 = vadd.f32 1e-05, %v1488_v12 }
 0x52c   : > { %v1475_v38 = vpop.xlane.xlu1 %1474 }
 0x52d   : > { %1943 = vrsqrt.f32 %v1496_v36  ;;  %v1491_v41 = vmul.f32 0.03125, %v1475_v38 }
 0x52f   : > { %v1499_v46 = vadd.f32 1e-05, %v1491_v41 }
 0x530   : > { %v1469_v16 = vpop.xlane.xlu1 %1468 }
 0x531   : > { %1945 = vrsqrt.f32 %v1499_v46  ;;  %v1489_v47 = vmul.f32 0.03125, %v1469_v16 }
 0x533   : > { %v1497_v48 = vadd.f32 1e-05, %v1489_v47 }
 0x535   : > { %1947 = vrsqrt.f32 %v1497_v48 }
 0x536   : > { %v1942_v54 = vpop.eup %1941  ;;  %v1478_v31 = vpop.xlane.xlu0 %1477 }
 0x537   : > { %v1514_v27 = vmul.f32 %v1942_v54, %v2372_v45  ;;  %v1492_v32 = vmul.f32 0.03125, %v1478_v31 }
 0x539   : > { %v1529_v30 = vmul.f32 %v1714_v14, %v1514_v27  ;;  %v1500_v34 = vadd.f32 1e-05, %v1492_v32 }
 0x53a   : > { %v1944_v39 = vpop.eup %1943  ;;  %v1484_v43 = vpop.xlane.xlu0 %1483 }
 0x53b   : > { %v1544_v19 = vadd.f32 %v1715_v33, %v1529_v30  ;;  %v1512_v24 = vmul.f32 %v1944_v39, %v2376_v35  ;;  %1949 = vrsqrt.f32 %v1500_v34  ;;  %v1494_v44 = vmul.f32 0.03125, %v1484_v43  ;;  %v1481_v37 = vpop.xlane.xlu1 %1480 }
 0x53c   : > { %v1493_v45 = vmul.f32 0.03125, %v1481_v37 }
 0x53d   : > { %1552 = vst.msk [vmem:[%s2423_s19 + $0x10] sm:$0xff] %vm510_vm0, %v1544_v19  ;;  %v1527_v25 = vmul.f32 %v1714_v14, %v1512_v24  ;;  %v1502_v50 = vadd.f32 1e-05, %v1494_v44 }
 0x53e   : > { %v1946_v20 = vpop.eup %1945  ;;  %v1501_v52 = vadd.f32 1e-05, %v1493_v45 }
 0x53f   : > { %v1542_v56 = vadd.f32 %v1715_v33, %v1527_v25  ;;  %v1515_v59 = vmul.f32 %v1946_v20, %v2381_v0  ;;  %1951 = vrsqrt.f32 %v1502_v50  ;;  %v1487_v26 = vpop.xlane.xlu1 %1486 }
 0x540   : > { %1953 = vrsqrt.f32 %v1501_v52  ;;  %v1495_v35 = vmul.f32 0.03125, %v1487_v26 }
 0x541   : > { %1550 = vst.msk [vmem:[%s2423_s19] sm:$0xff] %vm510_vm0, %v1542_v56  ;;  %v1530_v61 = vmul.f32 %v1714_v14, %v1515_v59 }
 0x542   : > { %v1948_v40 = vpop.eup %1947  ;;  %v1503_v1 = vadd.f32 1e-05, %v1495_v35 }
 0x543   : > { %v1545_v6 = vadd.f32 %v1715_v33, %v1530_v61  ;;  %v1513_v8 = vmul.f32 %v1948_v40, %v2384_v2 }
 0x544   : > { %1955 = vrsqrt.f32 %v1503_v1 }
 0x545   : > { %1553 = vst.msk [vmem:[%s2423_s19 + $0x18] sm:$0xff] %vm510_vm0, %v1545_v6  ;;  %v1528_v42 = vmul.f32 %v1714_v14, %v1513_v8 }
 0x547   : > { %v1543_v9 = vadd.f32 %v1715_v33, %v1528_v42 }
 0x548   : > { %v1950_v0 = vpop.eup %1949 }
 0x549   : > { %1551 = vst.msk [vmem:[%s2423_s19 + $0x8] sm:$0xff] %vm510_vm0, %v1543_v9  ;;  %v1516_v10 = vmul.f32 %v1950_v0, %v2392_v28 }
 0x54b   : > { %v1531_v23 = vmul.f32 %v1714_v14, %v1516_v10 }
 0x54c   : > { %v1952_v29 = vpop.eup %1951 }
 0x54d   : > { %v1954_v22 = vpop.eup %1953  ;;  %v1546_v11 = vadd.f32 %v1715_v33, %v1531_v23  ;;  %v1518_v60 = vmul.f32 %v1952_v29, %v2396_v51 }
 0x54e   : > { %v1517_v2 = vmul.f32 %v1954_v22, %v2399_v53 }
 0x54f   : > { %1554 = vst.msk [vmem:[%s2423_s19 + $0x20] sm:$0xff] %vm510_vm0, %v1546_v11  ;;  %v1533_v4 = vmul.f32 %v1714_v14, %v1518_v60 }
 0x550   : > { %v1532_v49 = vmul.f32 %v1714_v14, %v1517_v2 }
 0x551   : > { %v1956_v55 = vpop.eup %1955  ;;  %v1548_v57 = vadd.f32 %v1715_v33, %v1533_v4 }
 0x552   : > { %v1547_v58 = vadd.f32 %v1715_v33, %v1532_v49  ;;  %v1519_v62 = vmul.f32 %v1956_v55, %v2406_v3 }
 0x553   : > { %1556 = vst.msk [vmem:[%s2423_s19 + $0x30] sm:$0xff] %vm510_vm0, %v1548_v57 }
 0x554   : > { %1555 = vst.msk [vmem:[%s2423_s19 + $0x28] sm:$0xff] %vm510_vm0, %v1547_v58  ;;  %v1534_v28 = vmul.f32 %v1714_v14, %v1519_v62 }
 0x556   : > { %v1549_v63 = vadd.f32 %v1715_v33, %v1534_v28 }
 0x558   : > { %1557 = vst.msk [vmem:[%s2423_s19 + $0x38] sm:$0xff] %vm510_vm0, %v1549_v63 }
 0x559 PF: > { %s22_s21 = sadd.s32 1, %s1979_s21   ;;  %s2469_s19 = smov %s1975_s20 }
 0x55a   : > { %p19_p5 = scmp.ge.s32.totalorder %s22_s21, 4   ;;  %s2470_s20 = smov %s2472_s8 }
 0x55c   :  { %21 = sbr.rel (!%p19_p5) target bundleno = 2 (0x2), region = 105 }

</bundles_post_ra>
